<compile_context>
chip_gen: v7x
topology: tpu7x:2x2x1
jax: 0.10.0
libtpu: 0.0.40
codegen_flags: <defaults>
</compile_context>

<pallas_src>
import functools
import math

import numpy as np
import jax
import jax.numpy as jnp
from jax.experimental import pallas as pl
from jax.experimental.pallas import tpu as pltpu


def make_interp_matrix(in_size: int, out_size: int, mode: str) -> np.ndarray:
    """Row-stochastic resampling matrix matching PyTorch F.interpolate semantics."""
    M = np.zeros((out_size, in_size), dtype=np.float32)
    ratio = in_size / out_size
    for d in range(out_size):
        if mode == "nearest":
            s = min(int(math.floor(d * ratio)), in_size - 1)
            M[d, s] = 1.0
        elif mode in ("bilinear", "linear"):
            # align_corners=False -> half-pixel centers, clamped at 0 (PyTorch rule).
            src = (d + 0.5) * ratio - 0.5
            src = max(src, 0.0)
            i0 = min(int(math.floor(src)), in_size - 1)
            i1 = min(i0 + 1, in_size - 1)
            lam = min(max(src - i0, 0.0), 1.0)
            M[d, i0] += 1.0 - lam
            M[d, i1] += lam
        else:
            raise NotImplementedError(f"mode={mode}")
    return M


def _interp_kernel(wh_ref, wwt_ref, x_ref, o_ref, *, blk, h, h_out, w_out, k):
    # wh : (H_out, H)         H-pass weight (plain, no kron)
    # wwt: (W, W_out)         (= Ww^T)
    # x  : (blk*H, W)         block of `blk` whole images, rows = b*H + h
    # o  : (blk*H_out/k, k*W_out)  lane-packed output block (k == 1 -> unpacked)
    hpk = h_out // k
    wh = wh_ref[...]
    wwt = wwt_ref[...]
    x = x_ref[...].astype(jnp.float32)
    # One folded W-pass matmul for the whole block.
    t = jnp.dot(x, wwt, preferred_element_type=jnp.float32)          # (blk*H, W_out)
    # Per-image H-pass: static unrolled loop, static slices -> no zero-FLOP
    # kron waste, no 3-D transposes, robust lowering.
    for b in range(blk):
        tb = t[b * h:(b + 1) * h, :]                                  # (H, W_out)
        yb = jnp.dot(wh, tb, preferred_element_type=jnp.float32)      # (H_out, W_out)
        if k > 1:
            # Sublane->lane packing: row r of the packed tile holds output
            # rows r*k .. r*k+k-1 (row-major identical flat buffer).
            yb = yb.reshape(hpk, k * w_out)
        o_ref[b * hpk:(b + 1) * hpk, :] = yb.astype(o_ref.dtype)


def _vmem_capacity_bytes() -> int:
    try:
        info = pltpu.get_tpu_info()
        for name in ("vmem_capacity_bytes", "vmem_size_bytes", "vmem_bytes"):
            v = getattr(info, name, None)
            if v:
                return int(v)
    except Exception:
        pass
    return 64 << 20  # conservative (v7x-sized) default


def _lane_pack_factor(w_out: int, h_out: int) -> int:
    """How many output rows to pack side-by-side along lanes (power of two)."""
    if w_out <= 0 or w_out >= 128 or (128 % w_out) != 0:
        return 1
    k = 128 // w_out
    while k > 1 and (h_out % k) != 0:
        k //= 2
    return k


def _pick_block(nc, h, w, h_out, w_out, k, in_bytes, out_bytes,
                budget, min_steps, max_blk=32):
    """How many whole (n, c) images to process per grid step."""

    def tiling_ok(b):
        if b == nc:
            return True  # full-extent blocks are always layout-legal
        # (8,128) rule on second-minor block dims (last dims are full-extent).
        return (b * h) % 8 == 0 and ((b * h_out) // k) % 8 == 0

    def footprint(b):
        blocks = 2 * b * (h * w * in_bytes + h_out * w_out * out_bytes)  # dbl-buffered I/O
        weights = 2 * (h_out * h + w * w_out) * 4                         # dbl-buffered weights
        interm = b * h * (w + w_out) * 4 + h_out * w_out * 4              # x_f32, t, yb
        return blocks + weights + interm

    legal = [b for b in range(1, min(nc, max_blk) + 1)
             if nc % b == 0 and tiling_ok(b)]
    if not legal:
        return nc  # last resort: full-array block (always layout-legal)
    fit = [b for b in legal if footprint(b) <= budget]
    if not fit:
        return min(legal)  # graceful: smallest legal block, never the full array
    pref = [b for b in fit if nc // b >= min_steps]
    return max(pref) if pref else max(fit)


def interpolate_pallas(x: jax.Array, scale: float = 2.0, mode: str = "bilinear") -> jax.Array:
    """x: (N, C, H, W) -> (N, C, floor(H*scale), floor(W*scale))."""
    N, C, H, W = x.shape
    H_out = int(math.floor(H * scale))
    W_out = int(math.floor(W * scale))
    NC = N * C

    wh = jnp.asarray(make_interp_matrix(H, H_out, mode))        # (H_out, H)
    wwt = jnp.asarray(make_interp_matrix(W, W_out, mode).T)     # (W, W_out)

    # Free (metadata-only) reshape: NCHW row-major -> rows of (N*C*H, W).
    x2 = x.reshape(NC * H, W)
    in_bytes = x.dtype.itemsize
    out_bytes = x.dtype.itemsize

    # Per-generation knobs: v7x-like parts (64 MiB VMEM/TC, 2 TCs) get a
    # tighter VMEM cap and want >=2 grid steps per core; 128-MiB single-TC
    # parts (v5e/v6e) get bigger blocks and only need steps for pipelining.
    vmem_cap = _vmem_capacity_bytes()
    small_vmem = vmem_cap < (96 << 20)
    vmem_limit = (40 << 20) if small_vmem else (64 << 20)
    budget = (vmem_limit * 3) // 4
    min_steps = 4 if small_vmem else 3

    def build(k):
        B = _pick_block(NC, H, W, H_out, W_out, k, in_bytes, out_bytes,
                        budget, min_steps)
        hpk = H_out // k
        kernel = functools.partial(_interp_kernel, blk=B, h=H,
                                   h_out=H_out, w_out=W_out, k=k)
        flops = 2 * NC * (H * W * W_out + H * H_out * W_out)
        bytes_acc = (NC * (H * W * in_bytes + H_out * W_out * out_bytes)
                     + (H_out * H + W * W_out) * 4)
        return pl.pallas_call(
            kernel,
            out_shape=jax.ShapeDtypeStruct((NC * H_out // k, k * W_out), x.dtype),
            grid_spec=pltpu.PrefetchScalarGridSpec(
                num_scalar_prefetch=0,
                grid=(NC // B,),
                in_specs=[
                    # Constant index maps -> weights DMA'd once, not per step.
                    pl.BlockSpec((H_out, H), lambda i: (0, 0)),
                    pl.BlockSpec((W, W_out), lambda i: (0, 0)),
                    pl.BlockSpec((B * H, W), lambda i: (i, 0)),
                ],
                out_specs=pl.BlockSpec((B * hpk, k * W_out), lambda i: (i, 0)),
            ),
            compiler_params=pltpu.CompilerParams(
                dimension_semantics=("parallel",),
                vmem_limit_bytes=vmem_limit,
            ),
            cost_estimate=pl.CostEstimate(
                flops=flops, transcendentals=0, bytes_accessed=bytes_acc),
        )

    k = _lane_pack_factor(W_out, H_out)
    try:
        out2 = build(k)(wh, wwt, x2)
    except Exception:
        if k == 1:
            raise
        # TODO(synk): sublane->lane reshape unsupported by this Mosaic build;
        # fall back to the lane-sparse (masked-store) output layout.
        out2 = build(1)(wh, wwt, x2)

    return out2.reshape(N, C, H_out, W_out)


if __name__ == "__main__":
    key = jax.random.PRNGKey(0)
    N, C, H, W = 2, 4, 16, 16
    x = jax.random.normal(key, (N, C, H, W), dtype=jnp.float32)

    scale, mode = 2.0, "bilinear"
    y = interpolate_pallas(x, scale=scale, mode=mode)
    y = jax.block_until_ready(y)

    # Reference: same interpolation matrices applied with plain jnp.
    wh = jnp.asarray(make_interp_matrix(H, y.shape[2], mode))
    ww = jnp.asarray(make_interp_matrix(W, y.shape[3], mode))
    y_ref = jnp.einsum("oh,nchw,pw->ncop", wh, x, ww)

    assert y.shape == (N, C, 2 * H, 2 * W), y.shape
    np.testing.assert_allclose(np.asarray(y), np.asarray(y_ref), rtol=1e-5, atol=1e-5)
    print("KERNEL_OK")
</pallas_src>

<mosaic_0001>
module attributes {stable_mosaic.version = 11 : i64} {
  func.func @_interp_kernel(%arg0: i32, %arg1: memref<32x16xf32, #tpu.memory_space<vmem>>, %arg2: memref<16x32xf32, #tpu.memory_space<vmem>>, %arg3: memref<32x16xf32, #tpu.memory_space<vmem>>, %arg4: memref<16x128xf32, #tpu.memory_space<vmem>>) attributes {dimension_semantics = [#tpu.dimension_semantics<parallel>], iteration_bounds = array<i64: 4>, scalar_prefetch = 0 : i64, scratch_operands = 0 : i64, tpu.core_type = #tpu.core_type<tc>, window_params = [{pipeline_mode = #tpu.pipeline_mode<synchronous>, transform_indices = @transform_0, window_bounds = array<i64: 32, 16>}, {pipeline_mode = #tpu.pipeline_mode<synchronous>, transform_indices = @transform_1, window_bounds = array<i64: 16, 32>}, {transform_indices = @transform_2, window_bounds = array<i64: 32, 16>}, {transform_indices = @transform_3, window_bounds = array<i64: 16, 128>}]} {
    %c0 = arith.constant 0 : index
    %c0_0 = arith.constant 0 : index
    %0 = vector.load %arg1[%c0, %c0_0] : memref<32x16xf32, #tpu.memory_space<vmem>>, vector<32x16xf32>
    %c0_1 = arith.constant 0 : index
    %c0_2 = arith.constant 0 : index
    %1 = vector.load %arg2[%c0_1, %c0_2] : memref<16x32xf32, #tpu.memory_space<vmem>>, vector<16x32xf32>
    %c0_3 = arith.constant 0 : index
    %c0_4 = arith.constant 0 : index
    %2 = vector.load %arg3[%c0_3, %c0_4] : memref<32x16xf32, #tpu.memory_space<vmem>>, vector<32x16xf32>
    %cst = arith.constant dense<0.000000e+00> : vector<32x32xf32>
    %3 = tpu.matmul %2, %1, %cst {dimension_numbers = #tpu.dot_dimension_numbers<[1], [0], [0], [1], [0, 0, 1, 1], [], []>} : vector<32x16xf32>, vector<16x32xf32>, vector<32x32xf32> -> vector<32x32xf32>
    %4 = vector.extract_strided_slice %3 {offsets = [0, 0], sizes = [16, 32], strides = [1, 1]} : vector<32x32xf32> to vector<16x32xf32>
    %cst_5 = arith.constant dense<0.000000e+00> : vector<32x32xf32>
    %5 = tpu.matmul %0, %4, %cst_5 {dimension_numbers = #tpu.dot_dimension_numbers<[1], [0], [0], [1], [0, 0, 1, 1], [], []>} : vector<32x16xf32>, vector<16x32xf32>, vector<32x32xf32> -> vector<32x32xf32>
    %6 = vector.shape_cast %5 : vector<32x32xf32> to vector<8x128xf32>
    %c0_6 = arith.constant 0 : index
    %c0_7 = arith.constant 0 : index
    %7 = vector.load %arg4[%c0_6, %c0_7] : memref<16x128xf32, #tpu.memory_space<vmem>>, vector<8x128xf32>
    tpu.vector_store %arg4[%c0_6, %c0_7], %6 {strides = array<i32>} : memref<16x128xf32, #tpu.memory_space<vmem>>, vector<8x128xf32>,
    %8 = vector.extract_strided_slice %3 {offsets = [16, 0], sizes = [16, 32], strides = [1, 1]} : vector<32x32xf32> to vector<16x32xf32>
    %cst_8 = arith.constant dense<0.000000e+00> : vector<32x32xf32>
    %9 = tpu.matmul %0, %8, %cst_8 {dimension_numbers = #tpu.dot_dimension_numbers<[1], [0], [0], [1], [0, 0, 1, 1], [], []>} : vector<32x16xf32>, vector<16x32xf32>, vector<32x32xf32> -> vector<32x32xf32>
    %10 = vector.shape_cast %9 : vector<32x32xf32> to vector<8x128xf32>
    %c8 = arith.constant 8 : index
    %c0_9 = arith.constant 0 : index
    %11 = vector.load %arg4[%c8, %c0_9] : memref<16x128xf32, #tpu.memory_space<vmem>>, vector<8x128xf32>
    tpu.vector_store %arg4[%c8, %c0_9], %10 {strides = array<i32>} : memref<16x128xf32, #tpu.memory_space<vmem>>, vector<8x128xf32>,
    return
  }
  func.func @transform_0(%arg0: i32) -> (i32, i32) {
    %c0_i32 = arith.constant 0 : i32
    %c0_i32_0 = arith.constant 0 : i32
    %c0_i32_1 = arith.constant 0 : i32
    return %c0_i32, %c0_i32_0 : i32, i32
  }
  func.func @transform_1(%arg0: i32) -> (i32, i32) {
    %c0_i32 = arith.constant 0 : i32
    %c0_i32_0 = arith.constant 0 : i32
    %c0_i32_1 = arith.constant 0 : i32
    return %c0_i32, %c0_i32_0 : i32, i32
  }
  func.func @transform_2(%arg0: i32) -> (i32, i32) {
    %c0_i32 = arith.constant 0 : i32
    %c0_i32_0 = arith.constant 0 : i32
    return %arg0, %c0_i32 : i32, i32
  }
  func.func @transform_3(%arg0: i32) -> (i32, i32) {
    %c0_i32 = arith.constant 0 : i32
    %c0_i32_0 = arith.constant 0 : i32
    return %arg0, %c0_i32 : i32, i32
  }
}

module attributes {stable_mosaic.version = 11 : i64} {
  func.func @_interp_kernel(%arg0: i32, %arg1: memref<32x16xf32, #tpu.memory_space<vmem>>, %arg2: memref<16x32xf32, #tpu.memory_space<vmem>>, %arg3: memref<32x16xf32, #tpu.memory_space<vmem>>, %arg4: memref<64x32xf32, #tpu.memory_space<vmem>>) attributes {dimension_semantics = [#tpu.dimension_semantics<parallel>], iteration_bounds = array<i64: 4>, scalar_prefetch = 0 : i64, scratch_operands = 0 : i64, tpu.core_type = #tpu.core_type<tc>, window_params = [{pipeline_mode = #tpu.pipeline_mode<synchronous>, transform_indices = @transform_0, window_bounds = array<i64: 32, 16>}, {pipeline_mode = #tpu.pipeline_mode<synchronous>, transform_indices = @transform_1, window_bounds = array<i64: 16, 32>}, {transform_indices = @transform_2, window_bounds = array<i64: 32, 16>}, {transform_indices = @transform_3, window_bounds = array<i64: 64, 32>}]} {
    %c0 = arith.constant 0 : index
    %c0_0 = arith.constant 0 : index
    %0 = vector.load %arg1[%c0, %c0_0] : memref<32x16xf32, #tpu.memory_space<vmem>>, vector<32x16xf32>
    %c0_1 = arith.constant 0 : index
    %c0_2 = arith.constant 0 : index
    %1 = vector.load %arg2[%c0_1, %c0_2] : memref<16x32xf32, #tpu.memory_space<vmem>>, vector<16x32xf32>
    %c0_3 = arith.constant 0 : index
    %c0_4 = arith.constant 0 : index
    %2 = vector.load %arg3[%c0_3, %c0_4] : memref<32x16xf32, #tpu.memory_space<vmem>>, vector<32x16xf32>
    %cst = arith.constant dense<0.000000e+00> : vector<32x32xf32>
    %3 = tpu.matmul %2, %1, %cst {dimension_numbers = #tpu.dot_dimension_numbers<[1], [0], [0], [1], [0, 0, 1, 1], [], []>} : vector<32x16xf32>, vector<16x32xf32>, vector<32x32xf32> -> vector<32x32xf32>
    %4 = vector.extract_strided_slice %3 {offsets = [0, 0], sizes = [16, 32], strides = [1, 1]} : vector<32x32xf32> to vector<16x32xf32>
    %cst_5 = arith.constant dense<0.000000e+00> : vector<32x32xf32>
    %5 = tpu.matmul %0, %4, %cst_5 {dimension_numbers = #tpu.dot_dimension_numbers<[1], [0], [0], [1], [0, 0, 1, 1], [], []>} : vector<32x16xf32>, vector<16x32xf32>, vector<32x32xf32> -> vector<32x32xf32>
    %c0_6 = arith.constant 0 : index
    %c0_7 = arith.constant 0 : index
    %6 = vector.load %arg4[%c0_6, %c0_7] : memref<64x32xf32, #tpu.memory_space<vmem>>, vector<32x32xf32>
    tpu.vector_store %arg4[%c0_6, %c0_7], %5 {strides = array<i32>} : memref<64x32xf32, #tpu.memory_space<vmem>>, vector<32x32xf32>,
    %7 = vector.extract_strided_slice %3 {offsets = [16, 0], sizes = [16, 32], strides = [1, 1]} : vector<32x32xf32> to vector<16x32xf32>
    %cst_8 = arith.constant dense<0.000000e+00> : vector<32x32xf32>
    %8 = tpu.matmul %0, %7, %cst_8 {dimension_numbers = #tpu.dot_dimension_numbers<[1], [0], [0], [1], [0, 0, 1, 1], [], []>} : vector<32x16xf32>, vector<16x32xf32>, vector<32x32xf32> -> vector<32x32xf32>
    %c32 = arith.constant 32 : index
    %c0_9 = arith.constant 0 : index
    %9 = vector.load %arg4[%c32, %c0_9] : memref<64x32xf32, #tpu.memory_space<vmem>>, vector<32x32xf32>
    tpu.vector_store %arg4[%c32, %c0_9], %8 {strides = array<i32>} : memref<64x32xf32, #tpu.memory_space<vmem>>, vector<32x32xf32>,
    return
  }
  func.func @transform_0(%arg0: i32) -> (i32, i32) {
    %c0_i32 = arith.constant 0 : i32
    %c0_i32_0 = arith.constant 0 : i32
    %c0_i32_1 = arith.constant 0 : i32
    return %c0_i32, %c0_i32_0 : i32, i32
  }
  func.func @transform_1(%arg0: i32) -> (i32, i32) {
    %c0_i32 = arith.constant 0 : i32
    %c0_i32_0 = arith.constant 0 : i32
    %c0_i32_1 = arith.constant 0 : i32
    return %c0_i32, %c0_i32_0 : i32, i32
  }
  func.func @transform_2(%arg0: i32) -> (i32, i32) {
    %c0_i32 = arith.constant 0 : i32
    %c0_i32_0 = arith.constant 0 : i32
    return %arg0, %c0_i32 : i32, i32
  }
  func.func @transform_3(%arg0: i32) -> (i32, i32) {
    %c0_i32 = arith.constant 0 : i32
    %c0_i32_0 = arith.constant 0 : i32
    return %arg0, %c0_i32 : i32, i32
  }
}

</mosaic_0001>

<bundles_post_ra>
// kernel: tpu_custom_call.1
= control target key start
LH: loop header
LB: loop body
LE: loop exit
PB: predicated region body
PF: predicated region fallthrough
CT: control target
= control target key end

     0   :  { %s650_s12 = smov 0   ;;  %s709_s0 = inlined_call_operand.vmem [shape: f32[32,16], index: 0, kind: input, shape index: {}]   ;;  %s710_s1 = inlined_call_operand.vmem [shape: f32[16,32], index: 1, kind: input, shape index: {}]   ;;  %s711_s2 = inlined_call_operand.vmem [shape: f32[128,16], index: 2, kind: input, shape index: {}]   ;;  %s712_s3 = inlined_call_operand.vmem [shape: f32[256,32], index: 3, kind: output, shape index: {}]  }
   0x1 LB: > { %s529_s13 = sadd.s32 4294967295, %s628_s12   ;;  %p533_p0 = scmp.ge.s32.totalorder %s628_s12, 1  ;;  %s628_s12 = sphi %s650_s12, %s13_s12  }
   0x2   : > { %p138_p1 = scmp.lt.s32.totalorder %s628_s12, 5 }
   0x4   : > { %p139_p2 = pnand %p533_p0, %p138_p1 }
   0x5   : > { %v178_v0 = vld [vmem:[%s710_s1] sm:$0xff] (!%p139_p2)  ;;  %v179_v1 = vld [vmem:[%s710_s1 + $0x8] sm:$0xff] (!%p139_p2)  ;;  %s534_s18 = sshll.u32 (!%p139_p2), %s529_s13, 2  ;;  %vm184_vm0 = vcmask (!%p139_p2), 130048   ;;  %v176_v15 = vld [vmem:[%s709_s0 + $0x10] sm:$0xff] (!%p139_p2)  ;;  %s536_s4 = sshll.u32 (!%p139_p2), %s529_s13, 3 }
   0x6   : > { %142 = sbr.rel (%p139_p2) target bundleno = 455 (0x1c7), region = 32  ;;  %v600_v2 = vpack.c.bf16 (!%p139_p2), %v179_v1, %v178_v0  ;;  %p163_p3 = scmp.lt.s32.totalorder (!%p139_p2), %s534_s18, 15  ;;  %v174_v7 = vld [vmem:[%s709_s0] sm:$0xff] (!%p139_p2)  ;;  %v175_v14 = vld [vmem:[%s709_s0 + $0x8] sm:$0xff] (!%p139_p2)  ;;  %v177_v16 = vld [vmem:[%s709_s0 + $0x18] sm:$0xff] (!%p139_p2)  ;;  %vm379_vm1 = vcmask (!%p139_p2), 261120  }
   0x7   : > { %p169_p4 = scmp.lt.s32.totalorder (!%p139_p2), %s536_s4, 31 }
   0x8   : > { %601 = vmatprep.subr.bf16.mxu0 (!%p139_p2), %v600_v2  ;;  %612 = vmatprep.subr.bf16.mxu1 (!%p139_p2), %v600_v2 }
   0x9   : > { %603 = vmatpush3.bf16.msra.mxu0 (!%p139_p2), %v600_v2  ;;  %613 = vmatpush3.bf16.msra.mxu1 (!%p139_p2), %v600_v2 }
   0xd   : > { %s714_s18 = smov (!%p163_p3, %s534_s18), 15  ;;  %s716_s4 = smov (!%p169_p4, %s536_s4), 31 }
   0xe   : > { %s535_s19 = sshll.u32 %s714_s18, 3  ;;  %s537_s5 = sshll.u32 %s716_s4, 3 }
   0xf   : > { %s166_s22 = scalar_lea.vmem %s711_s2, %s535_s19  ;;  %s172_s8 = scalar_lea.vmem %s712_s3, %s537_s5 }
  0x10   : > { %v180_v3 = vld [vmem:[%s166_s22] sm:$0xff]  ;;  %v182_v4 = vld [vmem:[%s166_s22 + $0x10] sm:$0xff]  ;;  %v181_v5 = vld [vmem:[%s166_s22 + $0x8] sm:$0xff] }
  0x11   : > { %574 = vmatprep.mubr.msk.f32.mxu0 %vm184_vm0, %v180_v3  ;;  %577 = vmatprep.mubr.msk.f32.mxu1 %vm184_vm0, %v182_v4  ;;  %v183_v6 = vld [vmem:[%s166_s22 + $0x18] sm:$0xff] }
  0x12   : > { %575 = vmatmul.mubr.msk.f32.vlgmr.msra.gmra.mrb[0].mxu0 %vm184_vm0, %v181_v5  ;;  %578 = vmatmul.mubr.msk.f32.vlgmr.msra.gmra.mrb[0].mxu1 %vm184_vm0, %v183_v6 }
  0x13   : > { %584 = vmatprep.mubr.msk.f32.mxu1 %vm184_vm0, %v174_v7  ;;  %594 = vmatprep.mubr.msk.f32.mxu0 %vm184_vm0, %v174_v7 }
  0xe5   : > { %v576_v8 = vpop.f32.mrb[0].mxu0  ;;  %v579_v9 = vpop.f32.mrb[0].mxu1 }
  0xe6   : > { %v263_v10 = vpop.f32.mrb[1].mxu0  ;;  %v273_v11 = vpop.f32.mrb[1].mxu1 }
  0xe7   : > { %v604_v12 = vpack.c.bf16 %v576_v8, %v263_v10  ;;  %v608_v13 = vpack.c.bf16 %v579_v9, %v273_v11 }
  0xe9   : > { %605 = vmatprep.subr.bf16.mxu1 %v604_v12  ;;  %609 = vmatprep.subr.bf16.mxu0 %v608_v13 }
  0xea   : > { %607 = vmatpush3.bf16.msra.mxu1 %v604_v12  ;;  %611 = vmatpush3.bf16.msra.mxu0 %v608_v13 }
  0xed   : > { %585 = vmatmul.mubr.msk.f32.vlgmr.msra.gmra.mrb[2].mxu1 %vm184_vm0, %v175_v14  ;;  %595 = vmatmul.mubr.msk.f32.vlgmr.msra.gmra.mrb[2].mxu0 %vm184_vm0, %v175_v14 }
  0xee   : > { %587 = vmatprep.mubr.msk.f32.mxu1 %vm184_vm0, %v176_v15  ;;  %597 = vmatprep.mubr.msk.f32.mxu0 %vm184_vm0, %v176_v15 }
  0xf1   : > { %588 = vmatmul.mubr.msk.f32.gmra.mrb[4].mxu1 %vm184_vm0, %v177_v16  ;;  %598 = vmatmul.mubr.msk.f32.gmra.mrb[4].mxu0 %vm184_vm0, %v177_v16 }
 0x1c0   : > { %v586_v17 = vpop.f32.mrb[2].mxu1  ;;  %v596_v18 = vpop.f32.mrb[2].mxu0 }
 0x1c1   : > { %381 = vst.msk [vmem:[%s172_s8 + $0x8] sm:$0xff] %vm379_vm1, %v586_v17  ;;  %470 = vst.msk [vmem:[%s172_s8 + $0x28] sm:$0xff] %vm379_vm1, %v596_v18  ;;  %v360_v19 = vpop.f32.mrb[3].mxu1  ;;  %v450_v20 = vpop.f32.mrb[3].mxu0 }
 0x1c2   : > { %380 = vst.msk [vmem:[%s172_s8] sm:$0xff] %vm379_vm1, %v360_v19  ;;  %469 = vst.msk [vmem:[%s172_s8 + $0x20] sm:$0xff] %vm379_vm1, %v450_v20 }
 0x1c4   : > { %v589_v21 = vpop.f32.mrb[4].mxu1  ;;  %v599_v22 = vpop.f32.mrb[4].mxu0 }
 0x1c5   : > { %383 = vst.msk [vmem:[%s172_s8 + $0x18] sm:$0xff] %vm379_vm1, %v589_v21  ;;  %472 = vst.msk [vmem:[%s172_s8 + $0x38] sm:$0xff] %vm379_vm1, %v599_v22  ;;  %v370_v23 = vpop.f32.mrb[5].mxu1  ;;  %v460_v24 = vpop.f32.mrb[5].mxu0 }
 0x1c6   : > { %382 = vst.msk [vmem:[%s172_s8 + $0x10] sm:$0xff] %vm379_vm1, %v370_v23  ;;  %471 = vst.msk [vmem:[%s172_s8 + $0x30] sm:$0xff] %vm379_vm1, %v460_v24 }
 0x1c7 PF: > { %s13_s12 = sadd.s32 1, %s628_s12  }
 0x1c8   : > { %p10_p5 = scmp.ge.s32.totalorder %s13_s12, 6  }
 0x1ca   :  { %12 = sbr.rel (!%p10_p5) target bundleno = 1 (0x1), region = 62 }

</bundles_post_ra>
